<compile_context>
chip_gen: v5e
topology: v5e:2x2
jax: 0.10.0
libtpu: 0.0.40
codegen_flags: <defaults>
</compile_context>

<pallas_src>
import functools

import jax
import jax.numpy as jnp
from jax import lax
from jax.experimental import pallas as pl
from jax.experimental.pallas import tpu as pltpu


def _round_up(x, m):
    return (x + m - 1) // m * m


def _cnn_kernel(w_ref, b_ref, x_ref, o_ref, *, n_layers, B, H, W):
    # w_ref: SMEM (L*9,) f32   flattened 3x3 weights, layer-major
    # b_ref: SMEM (L,)   f32   biases
    # x_ref: VMEM (B, H, W) f32   one batch block of images
    # o_ref: VMEM (B, 128)  f32   pooled value per image, broadcast across lanes
    cur = x_ref[...].astype(jnp.float32)                       # (B, H, W)
    h, w = H, W
    for l in range(n_layers):                                  # static unroll over layers
        oh, ow = h - 2, w - 2
        acc = jnp.zeros((B, oh, ow), jnp.float32)
        # 3x3 "valid" conv = 9 scalar-weighted shifted adds (VPU), batched over B.
        for di in range(3):
            for dj in range(3):
                acc = acc + w_ref[l * 9 + di * 3 + dj] * cur[:, di:di + oh, dj:dj + ow]
        cur = acc + b_ref[l]
        h, w = oh, ow
    # AdaptiveAvgPool2d(1): mean over the remaining spatial extent, per image.
    s = jnp.sum(jnp.sum(cur, axis=2), axis=1, keepdims=True)   # (B, 1)
    pooled = s * (1.0 / (h * w))
    o_ref[...] = jnp.broadcast_to(pooled, (B, 128))            # lane-dense store


def simple_cnn_forward(x_nchw, weights, biases, *, imgs_per_block_cap=256):
    """x_nchw: (N, 1, H, W) f32. weights: (L, 3, 3) f32. biases: (L,) f32."""
    N, C, H, W = x_nchw.shape
    assert C == 1, "SimpleCNN uses a single channel"
    L = int(weights.shape[0])
    assert H > 2 * L and W > 2 * L, "spatial extent too small for the conv chain"

    # Pad batch to a multiple of 8 (sublane tile) and of the block size.
    n_pad = _round_up(N, 8)
    b_img = min(n_pad, imgs_per_block_cap)
    n_pad = _round_up(n_pad, b_img)
    x = x_nchw[:, 0, :, :]                                     # (N, H, W)
    if n_pad != N:
        x = jnp.pad(x, ((0, n_pad - N), (0, 0), (0, 0)))

    w_flat = weights.reshape(L * 9).astype(jnp.float32)        # 1-D SMEM buffer
    b_flat = biases.astype(jnp.float32)

    kernel = functools.partial(_cnn_kernel, n_layers=L, B=b_img, H=H, W=W)

    out_slab = pl.pallas_call(
        kernel,
        out_shape=jax.ShapeDtypeStruct((n_pad, 128), jnp.float32),
        grid_spec=pltpu.PrefetchScalarGridSpec(
            num_scalar_prefetch=0,
            grid=(n_pad // b_img,),                            # one step per batch block
            in_specs=[
                pl.BlockSpec(memory_space=pltpu.MemorySpace.SMEM),  # weights (L*9,)
                pl.BlockSpec(memory_space=pltpu.MemorySpace.SMEM),  # biases  (L,)
                pl.BlockSpec((b_img, H, W), lambda g: (g, 0, 0)),   # batch block
            ],
            out_specs=pl.BlockSpec((b_img, 128), lambda g: (g, 0)),
        ),
        compiler_params=pltpu.CompilerParams(
            dimension_semantics=("parallel",)),                # v7x megacore when N grows
    )(w_flat, b_flat, x)

    # (N, 1, 1, 1) to match PyTorch AdaptiveAvgPool2d(1) on NCHW.
    return out_slab[:N, 0].reshape(N, 1, 1, 1)


def _reference_forward(x_nchw, weights, biases):
    """Pure-JAX reference using lax.conv_general_dilated (NCHW / OIHW)."""
    y = x_nchw
    for l in range(weights.shape[0]):
        w = weights[l].reshape(1, 1, 3, 3)
        y = lax.conv_general_dilated(
            y, w, window_strides=(1, 1), padding="VALID",
            dimension_numbers=("NCHW", "OIHW", "NCHW")) + biases[l]
    return jnp.mean(y, axis=(2, 3), keepdims=True)


if __name__ == "__main__":
    N, H, W = 2, 16, 16                      # small NCHW input: (2, 1, 16, 16)
    key = jax.random.PRNGKey(0)
    kx, kw, kb = jax.random.split(key, 3)
    x = jax.random.normal(kx, (N, 1, H, W), dtype=jnp.float32)

    # Deterministic Conv2d(1,1,3)-style init: weight (3,3), bias (1,) per layer.
    fan_in = 1 * 3 * 3
    bound = 1.0 / (fan_in ** 0.5)

    for n_layers in (1, 2, 3):               # SimpleCNN supports n_layers in {1,2,3}
        kwl, kbl = jax.random.split(jax.random.fold_in(kw, n_layers))
        weights = jax.random.uniform(kwl, (n_layers, 3, 3), jnp.float32, -bound, bound)
        biases = jax.random.uniform(kbl, (n_layers,), jnp.float32, -bound, bound)

        out = jax.block_until_ready(simple_cnn_forward(x, weights, biases))
        ref = _reference_forward(x, weights, biases)
        assert out.shape == (N, 1, 1, 1), out.shape
        assert jnp.allclose(out, ref, atol=1e-5, rtol=1e-5), (n_layers, out, ref)

    print("KERNEL_OK")
</pallas_src>

<mosaic_0001>
module attributes {stable_mosaic.version = 11 : i64} {
  func.func @_cnn_kernel(%arg0: i32, %arg1: memref<9xf32, #tpu.memory_space<smem>>, %arg2: memref<1xf32, #tpu.memory_space<smem>>, %arg3: memref<8x16x16xf32, #tpu.memory_space<vmem>>, %arg4: memref<8x128xf32, #tpu.memory_space<vmem>>) attributes {dimension_semantics = [#tpu.dimension_semantics<parallel>], iteration_bounds = array<i64: 1>, scalar_prefetch = 0 : i64, scratch_operands = 0 : i64, tpu.core_type = #tpu.core_type<tc>, window_params = [{transform_indices = @transform_0, window_bounds = array<i64: 9>}, {transform_indices = @transform_1, window_bounds = array<i64: 1>}, {transform_indices = @transform_2, window_bounds = array<i64: 8, 16, 16>}, {transform_indices = @transform_3, window_bounds = array<i64: 8, 128>}]} {
    %c0 = arith.constant 0 : index
    %c0_0 = arith.constant 0 : index
    %c0_1 = arith.constant 0 : index
    %0 = vector.load %arg3[%c0, %c0_0, %c0_1] : memref<8x16x16xf32, #tpu.memory_space<vmem>>, vector<8x16x16xf32>
    %cst = arith.constant 0.000000e+00 : f32
    %1 = vector.broadcast %cst : f32 to vector<8x14x14xf32>
    %c0_2 = arith.constant 0 : index
    %2 = memref.load %arg1[%c0_2] : memref<9xf32, #tpu.memory_space<smem>>
    %3 = vector.extract_strided_slice %0 {offsets = [0, 0, 0], sizes = [8, 14, 14], strides = [1, 1, 1]} : vector<8x16x16xf32> to vector<8x14x14xf32>
    %4 = vector.broadcast %2 : f32 to vector<8x14x14xf32>
    %5 = arith.mulf %4, %3 : vector<8x14x14xf32>
    %6 = arith.addf %1, %5 : vector<8x14x14xf32>
    %c1 = arith.constant 1 : index
    %7 = memref.load %arg1[%c1] : memref<9xf32, #tpu.memory_space<smem>>
    %8 = vector.extract_strided_slice %0 {offsets = [0, 0, 1], sizes = [8, 14, 14], strides = [1, 1, 1]} : vector<8x16x16xf32> to vector<8x14x14xf32>
    %9 = vector.broadcast %7 : f32 to vector<8x14x14xf32>
    %10 = arith.mulf %9, %8 : vector<8x14x14xf32>
    %11 = arith.addf %6, %10 : vector<8x14x14xf32>
    %c2 = arith.constant 2 : index
    %12 = memref.load %arg1[%c2] : memref<9xf32, #tpu.memory_space<smem>>
    %13 = vector.extract_strided_slice %0 {offsets = [0, 0, 2], sizes = [8, 14, 14], strides = [1, 1, 1]} : vector<8x16x16xf32> to vector<8x14x14xf32>
    %14 = vector.broadcast %12 : f32 to vector<8x14x14xf32>
    %15 = arith.mulf %14, %13 : vector<8x14x14xf32>
    %16 = arith.addf %11, %15 : vector<8x14x14xf32>
    %c3 = arith.constant 3 : index
    %17 = memref.load %arg1[%c3] : memref<9xf32, #tpu.memory_space<smem>>
    %18 = vector.extract_strided_slice %0 {offsets = [0, 1, 0], sizes = [8, 14, 14], strides = [1, 1, 1]} : vector<8x16x16xf32> to vector<8x14x14xf32>
    %19 = vector.broadcast %17 : f32 to vector<8x14x14xf32>
    %20 = arith.mulf %19, %18 : vector<8x14x14xf32>
    %21 = arith.addf %16, %20 : vector<8x14x14xf32>
    %c4 = arith.constant 4 : index
    %22 = memref.load %arg1[%c4] : memref<9xf32, #tpu.memory_space<smem>>
    %23 = vector.extract_strided_slice %0 {offsets = [0, 1, 1], sizes = [8, 14, 14], strides = [1, 1, 1]} : vector<8x16x16xf32> to vector<8x14x14xf32>
    %24 = vector.broadcast %22 : f32 to vector<8x14x14xf32>
    %25 = arith.mulf %24, %23 : vector<8x14x14xf32>
    %26 = arith.addf %21, %25 : vector<8x14x14xf32>
    %c5 = arith.constant 5 : index
    %27 = memref.load %arg1[%c5] : memref<9xf32, #tpu.memory_space<smem>>
    %28 = vector.extract_strided_slice %0 {offsets = [0, 1, 2], sizes = [8, 14, 14], strides = [1, 1, 1]} : vector<8x16x16xf32> to vector<8x14x14xf32>
    %29 = vector.broadcast %27 : f32 to vector<8x14x14xf32>
    %30 = arith.mulf %29, %28 : vector<8x14x14xf32>
    %31 = arith.addf %26, %30 : vector<8x14x14xf32>
    %c6 = arith.constant 6 : index
    %32 = memref.load %arg1[%c6] : memref<9xf32, #tpu.memory_space<smem>>
    %33 = vector.extract_strided_slice %0 {offsets = [0, 2, 0], sizes = [8, 14, 14], strides = [1, 1, 1]} : vector<8x16x16xf32> to vector<8x14x14xf32>
    %34 = vector.broadcast %32 : f32 to vector<8x14x14xf32>
    %35 = arith.mulf %34, %33 : vector<8x14x14xf32>
    %36 = arith.addf %31, %35 : vector<8x14x14xf32>
    %c7 = arith.constant 7 : index
    %37 = memref.load %arg1[%c7] : memref<9xf32, #tpu.memory_space<smem>>
    %38 = vector.extract_strided_slice %0 {offsets = [0, 2, 1], sizes = [8, 14, 14], strides = [1, 1, 1]} : vector<8x16x16xf32> to vector<8x14x14xf32>
    %39 = vector.broadcast %37 : f32 to vector<8x14x14xf32>
    %40 = arith.mulf %39, %38 : vector<8x14x14xf32>
    %41 = arith.addf %36, %40 : vector<8x14x14xf32>
    %c8 = arith.constant 8 : index
    %42 = memref.load %arg1[%c8] : memref<9xf32, #tpu.memory_space<smem>>
    %43 = vector.extract_strided_slice %0 {offsets = [0, 2, 2], sizes = [8, 14, 14], strides = [1, 1, 1]} : vector<8x16x16xf32> to vector<8x14x14xf32>
    %44 = vector.broadcast %42 : f32 to vector<8x14x14xf32>
    %45 = arith.mulf %44, %43 : vector<8x14x14xf32>
    %46 = arith.addf %41, %45 : vector<8x14x14xf32>
    %c0_3 = arith.constant 0 : index
    %47 = memref.load %arg2[%c0_3] : memref<1xf32, #tpu.memory_space<smem>>
    %48 = vector.broadcast %47 : f32 to vector<8x14x14xf32>
    %49 = arith.addf %46, %48 : vector<8x14x14xf32>
    %cst_4 = arith.constant dense<0.000000e+00> : vector<8x14xf32>
    %50 = vector.multi_reduction <add>, %49, %cst_4 [2] : vector<8x14x14xf32> to vector<8x14xf32>
    %cst_5 = arith.constant dense<0.000000e+00> : vector<8xf32>
    %51 = vector.multi_reduction <add>, %50, %cst_5 [1] : vector<8x14xf32> to vector<8xf32>
    %52 = vector.shape_cast %51 : vector<8xf32> to vector<8x1xf32>
    %cst_6 = arith.constant 0.00510204071 : f32
    %53 = vector.broadcast %cst_6 : f32 to vector<8x1xf32>
    %54 = arith.mulf %52, %53 : vector<8x1xf32>
    %55 = vector.shape_cast %54 : vector<8x1xf32> to vector<8x1xf32>
    %56 = vector.broadcast %55 : vector<8x1xf32> to vector<8x128xf32>
    %c0_7 = arith.constant 0 : index
    %c0_8 = arith.constant 0 : index
    %57 = vector.load %arg4[%c0_7, %c0_8] : memref<8x128xf32, #tpu.memory_space<vmem>>, vector<8x128xf32>
    tpu.vector_store %arg4[%c0_7, %c0_8], %56 {strides = array<i32>} : memref<8x128xf32, #tpu.memory_space<vmem>>, vector<8x128xf32>,
    return
  }
  func.func @transform_0(%arg0: i32) -> i32 {
    %c0_i32 = arith.constant 0 : i32
    %c0_i32_0 = arith.constant 0 : i32
    return %c0_i32 : i32
  }
  func.func @transform_1(%arg0: i32) -> i32 {
    %c0_i32 = arith.constant 0 : i32
    %c0_i32_0 = arith.constant 0 : i32
    return %c0_i32 : i32
  }
  func.func @transform_2(%arg0: i32) -> (i32, i32, i32) {
    %c0_i32 = arith.constant 0 : i32
    %c0_i32_0 = arith.constant 0 : i32
    %c0_i32_1 = arith.constant 0 : i32
    return %arg0, %c0_i32, %c0_i32_0 : i32, i32, i32
  }
  func.func @transform_3(%arg0: i32) -> (i32, i32) {
    %c0_i32 = arith.constant 0 : i32
    %c0_i32_0 = arith.constant 0 : i32
    return %arg0, %c0_i32 : i32, i32
  }
}

</mosaic_0001>

<bundles_post_ra>
// kernel: tpu_custom_call.1
= control target key start
LH: loop header
LB: loop body
LE: loop exit
PB: predicated region body
PF: predicated region fallthrough
CT: control target
= control target key end

     0   :  { %9 = vsyncpa [#allocation6], 0  ;;  %s1900_s0 = inlined_call_operand.vmem [shape: f32[9], index: 0, kind: input, shape index: {}]   ;;  %s1901_s1 = inlined_call_operand.<no memory space> [shape: f32[1], index: 1, kind: input, shape index: {}]   ;;  %s1902_s2 = inlined_call_operand.hbm [shape: f32[8,16,16], index: 2, kind: input, shape index: {}]   ;;  %s1903_s3 = inlined_call_operand.hbm [shape: f32[8,128], index: 3, kind: output, shape index: {}]  }
   0x1   :  { %10 = vsyncpa [#allocation4], 0 }
   0x2   :  { %11 = vsyncpa [#allocation5], 0  ;;  %s17_s14 = sshll.u32 %s1900_s0, 4  ;;  %s27_s17 = sshll.u32 %s1902_s2, 4  ;;  %s18_s14 = int_to_ptr.vmem [resolvable:$true] %s17_s14  ;;  %s28_s17 = int_to_ptr.hbm [resolvable:$true] %s27_s17 }
   0x3   :  { %s1206_s18 = smov [#allocation3]   ;;  %s1207_s19 = smov [#allocation7]  }
   0x4   :  { %20 = dma.vmem_to_smem %s18_s14, 16, %s1206_s18, [#allocation6]  }
   0x5   :  { %s29_s20 = sshll.u32 %s1207_s19, 4  ;;  %s1208_s21 = smov 128   ;;  %s30_s20 = int_to_ptr.vmem [resolvable:$true] %s29_s20 }
   0x6   :  { %s1209_s22 = smov 8  }
   0x7   :  { %35 = dma.hbm_to_vmem [thread:$0]  %s28_s17, 2048, %s30_s20, [#allocation4], %s1208_s21, %s1208_s21, %s1209_s22  }
   0x8   :  { %1200 = dma.done.wait [#allocation6], 16  }
   0x9   :  { %1201 = vsyncadd [#allocation6], 4294967280 }
   0xa   :  { %1202 = dma.done.wait [#allocation4], 2048  }
   0xb   :  { %1203 = vsyncadd [#allocation4], 4294965248 }
   0xc   :  { %44 = sfence }
   0xd   :  { %s1111_s0 = sld [smem:[#allocation3 + $0x1]]  ;;  %v1239_v0 = vld [vmem:[#allocation7 + $0x20] sm:$0xff]  ;;  %v1241_v1 = vld [vmem:[#allocation7 + $0x10] sm:$0xff]  ;;  %s1210_s2 = smov 127   ;;  %v1251_v7 = vld [vmem:[#allocation7 + $0x28] sm:$0xff]  ;;  %vm325_vm0 = vcmask 1046528  }
   0xe   :  { %v1243_v2 = vld [vmem:[#allocation7] sm:$0xff]  ;;  %v1253_v8 = vld [vmem:[#allocation7 + $0x18] sm:$0xff]  ;;  %v1255_v9 = vld [vmem:[#allocation7 + $0x8] sm:$0xff]  ;;  %s1112_s23 = sld [smem:[#allocation3 + $0x2]]  ;;  %s1211_s24 = smov 126   ;;  %vm660_vm1 = vcmask 1045504  }
   0xf   :  { %v1263_v13 = vld [vmem:[#allocation7 + $0x40] sm:$0xff]  ;;  %v1265_v14 = vld [vmem:[#allocation7 + $0x38] sm:$0xff]  ;;  %v1267_v15 = vld [vmem:[#allocation7 + $0x30] sm:$0xff]  ;;  %s1114_s25 = sld [smem:[#allocation3 + $0x4]]  ;;  %vm979_vm2 = vcmask 113664   ;;  %vm983_vm3 = vcmask 111616  }
  0x10   :  { %v1275_v19 = vld [vmem:[#allocation7 + $0x58] sm:$0xff]  ;;  %v1277_v20 = vld [vmem:[#allocation7 + $0x50] sm:$0xff]  ;;  %v1279_v21 = vld [vmem:[#allocation7 + $0x48] sm:$0xff]  ;;  %s1115_s26 = sld [smem:[#allocation3 + $0x5]]  ;;  %vm1050_vm4 = vcmask 130112   ;;  %vm1073_vm5 = vcmask 1041409  }
  0x11   :  { %v1287_v25 = vld [vmem:[#allocation7 + $0x70] sm:$0xff]  ;;  %v1289_v26 = vld [vmem:[#allocation7 + $0x68] sm:$0xff]  ;;  %v1291_v27 = vld [vmem:[#allocation7 + $0x60] sm:$0xff]  ;;  %s61_s27 = sld [smem:[#allocation3]]  ;;  %vm1075_vm6 = vcmask 1042434   ;;  %vm1077_vm7 = vcmask 1043459  }
  0x12   :  { %v1299_v32 = vld [vmem:[#allocation7 + $0x78] sm:$0xff]  ;;  %s1117_s28 = sld [smem:[#allocation3 + $0x7]]  ;;  %vm1079_vm8 = vcmask 1044484   ;;  %vm1081_vm9 = vcmask 1045509   ;;  %vm1083_vm10 = vcmask 1046534   ;;  %vm1085_vm11 = vcmask 1047559  }
  0x13   :  { %v96_v3 = vstv %s1111_s0  ;;  %s1113_s29 = sld [smem:[#allocation3 + $0x3]]  ;;  %s1100_s10 = sshll.u32 %s1903_s3, 4  ;;  %s1101_s10 = int_to_ptr.hbm [resolvable:$true] %s1100_s10 }
  0x14   :  { %v101_v4 = vmul.f32 %v96_v3, %v1239_v0  ;;  %v99_v5 = vmul.f32 %v96_v3, %v1241_v1  ;;  %v97_v6 = vmul.f32 %v96_v3, %v1243_v2  ;;  %v102_v10 = vmul.f32 %v96_v3, %v1251_v7  ;;  %s1118_s30 = sld [smem:[#allocation3 + $0x8]] }
  0x15   :  { %v100_v11 = vmul.f32 %v96_v3, %v1253_v8  ;;  %v98_v12 = vmul.f32 %v96_v3, %v1255_v9  ;;  %v105_v16 = vmul.f32 %v96_v3, %v1263_v13  ;;  %v104_v17 = vmul.f32 %v96_v3, %v1265_v14  ;;  %s1116_s4 = sld [smem:[#allocation3 + $0x6]] }
  0x16   :  { %137 = vrot.lane.b32.xlu2 %v101_v4, %s1210_s2  ;;  %133 = vrot.lane.b32.xlu1 %v99_v5, %s1210_s2  ;;  %v103_v18 = vmul.f32 %v96_v3, %v1267_v15  ;;  %v108_v22 = vmul.f32 %v96_v3, %v1275_v19  ;;  %v107_v23 = vmul.f32 %v96_v3, %v1277_v20  ;;  %v194_v31 = vstv %s1112_s23 }
  0x17   :  { %129 = vrot.lane.b32.xlu0 %v97_v6, %s1210_s2  ;;  %v106_v24 = vmul.f32 %v96_v3, %v1279_v21  ;;  %v111_v28 = vmul.f32 %v96_v3, %v1287_v25  ;;  %v110_v29 = vmul.f32 %v96_v3, %v1289_v26  ;;  %v109_v30 = vmul.f32 %v96_v3, %v1291_v27 }
  0x18   :  { %v196_v33 = vmul.f32 %v194_v31, %v1255_v9  ;;  %v195_v34 = vmul.f32 %v194_v31, %v1243_v2  ;;  %v112_v35 = vmul.f32 %v96_v3, %v1299_v32  ;;  %v199_v36 = vmul.f32 %v194_v31, %v1239_v0 }
  0x19   :  { %v198_v37 = vmul.f32 %v194_v31, %v1253_v8  ;;  %v197_v38 = vmul.f32 %v194_v31, %v1241_v1  ;;  %v202_v39 = vmul.f32 %v194_v31, %v1265_v14  ;;  %v201_v40 = vmul.f32 %v194_v31, %v1267_v15 }
  0x1a   :  { %v200_v41 = vmul.f32 %v194_v31, %v1251_v7  ;;  %v205_v42 = vmul.f32 %v194_v31, %v1277_v20  ;;  %v204_v43 = vmul.f32 %v194_v31, %v1279_v21  ;;  %v203_v44 = vmul.f32 %v194_v31, %v1263_v13 }
  0x1b   :  { %v383_v45 = vstv %s1114_s25  ;;  %v208_v46 = vmul.f32 %v194_v31, %v1289_v26  ;;  %v207_v47 = vmul.f32 %v194_v31, %v1291_v27  ;;  %v206_v48 = vmul.f32 %v194_v31, %v1275_v19 }
  0x1c   :  { %v384_v49 = vmul.f32 %v383_v45, %v1243_v2  ;;  %v385_v50 = vmul.f32 %v383_v45, %v1255_v9  ;;  %v210_v53 = vmul.f32 %v194_v31, %v1299_v32  ;;  %v209_v55 = vmul.f32 %v194_v31, %v1287_v25 }
  0x1d   :  { %v387_v56 = vmul.f32 %v383_v45, %v1253_v8  ;;  %v386_v57 = vmul.f32 %v383_v45, %v1241_v1  ;;  %v390_v61 = vmul.f32 %v383_v45, %v1267_v15  ;;  %v391_v62 = vmul.f32 %v383_v45, %v1265_v14 }
  0x1e   :  { %139 = vrot.lane.b32.xlu2 %v102_v10, %s1210_s2  ;;  %135 = vrot.lane.b32.xlu1 %v100_v11, %s1210_s2  ;;  %v416_v51 = vrot.slane %v384_v49, 1  ;;  %v417_v52 = vrot.slane %v385_v50, 1  ;;  %v389_v63 = vmul.f32 %v383_v45, %v1251_v7  ;;  %v388_v3 = vmul.f32 %v383_v45, %v1239_v0 }
  0x1f   :  { %131 = vrot.lane.b32.xlu0 %v98_v12, %s1210_s2  ;;  %v420_v58 = vrot.slane %v387_v56, 1  ;;  %v419_v59 = vrot.slane %v386_v57, 1  ;;  %v425_v4 = vrot.slane %v390_v61, 1  ;;  %v426_v5 = vrot.slane %v391_v62, 1 }
  0x20   :  { %v418_v54 = vsel %vm325_vm0, %v416_v51, %v417_v52  ;;  %v423_v10 = vrot.slane %v389_v63, 1  ;;  %v422_v11 = vrot.slane %v388_v3, 1  ;;  %v395_v31 = vmul.f32 %v383_v45, %v1275_v19 }
  0x21   :  { %v421_v60 = vsel %vm325_vm0, %v419_v59, %v420_v58  ;;  %v427_v12 = vsel %vm325_vm0, %v425_v4, %v426_v5 }
  0x26   :  { %145 = vrot.lane.b32.xlu2 %v105_v16, %s1210_s2  ;;  %143 = vrot.lane.b32.xlu1 %v104_v17, %s1210_s2  ;;  %v393_v16 = vmul.f32 %v383_v45, %v1279_v21  ;;  %v392_v17 = vmul.f32 %v383_v45, %v1263_v13 }
  0x27   :  { %141 = vrot.lane.b32.xlu0 %v103_v18, %s1210_s2  ;;  %v424_v18 = vsel %vm325_vm0, %v422_v11, %v423_v10 }
  0x2e   :  { %151 = vrot.lane.b32.xlu2 %v108_v22, %s1210_s2  ;;  %149 = vrot.lane.b32.xlu1 %v107_v23, %s1210_s2  ;;  %v429_v22 = vrot.slane %v393_v16, 1  ;;  %v428_v23 = vrot.slane %v392_v17, 1 }
  0x2f   :  { %147 = vrot.lane.b32.xlu0 %v106_v24, %s1210_s2 }
  0x36   :  { %157 = vrot.lane.b32.xlu2 %v111_v28, %s1210_s2  ;;  %155 = vrot.lane.b32.xlu1 %v110_v29, %s1210_s2  ;;  %v430_v28 = vsel %vm325_vm0, %v428_v23, %v429_v22  ;;  %v396_v29 = vmul.f32 %v383_v45, %v1291_v27 }
  0x37   :  { %153 = vrot.lane.b32.xlu0 %v109_v30, %s1210_s2  ;;  %v397_v30 = vmul.f32 %v383_v45, %v1289_v26 }
  0x3e   :  { %229 = vrot.lane.b32.xlu2 %v196_v33, %s1211_s24  ;;  %227 = vrot.lane.b32.xlu1 %v195_v34, %s1211_s24  ;;  %v394_v33 = vmul.f32 %v383_v45, %v1277_v20  ;;  %v434_v34 = vrot.slane %v396_v29, 1 }
  0x3f   :  { %159 = vrot.lane.b32.xlu0 %v112_v35, %s1210_s2  ;;  %v435_v35 = vrot.slane %v397_v30, 1 }
  0x46   :  { %235 = vrot.lane.b32.xlu2 %v199_v36, %s1211_s24  ;;  %233 = vrot.lane.b32.xlu1 %v198_v37, %s1211_s24  ;;  %v432_v37 = vrot.slane %v395_v31, 1 }
  0x47   :  { %231 = vrot.lane.b32.xlu0 %v197_v38, %s1211_s24  ;;  %v431_v38 = vrot.slane %v394_v33, 1 }
  0x4e   :  { %241 = vrot.lane.b32.xlu2 %v202_v39, %s1211_s24  ;;  %239 = vrot.lane.b32.xlu1 %v201_v40, %s1211_s24  ;;  %v436_v39 = vsel %vm325_vm0, %v434_v34, %v435_v35  ;;  %v399_v40 = vmul.f32 %v383_v45, %v1299_v32 }
  0x4f   :  { %237 = vrot.lane.b32.xlu0 %v200_v41, %s1211_s24  ;;  %v398_v41 = vmul.f32 %v383_v45, %v1287_v25 }
  0x56   :  { %247 = vrot.lane.b32.xlu2 %v205_v42, %s1211_s24  ;;  %245 = vrot.lane.b32.xlu1 %v204_v43, %s1211_s24  ;;  %v433_v42 = vsel %vm325_vm0, %v431_v38, %v432_v37  ;;  %v438_v43 = vrot.slane %v399_v40, 1 }
  0x57   :  { %243 = vrot.lane.b32.xlu0 %v203_v44, %s1211_s24  ;;  %v437_v44 = vrot.slane %v398_v41, 1 }
  0x59   :  { %v439_v45 = vsel %vm325_vm0, %v437_v44, %v438_v43 }
  0x5e   :  { %253 = vrot.lane.b32.xlu2 %v208_v46, %s1211_s24  ;;  %251 = vrot.lane.b32.xlu1 %v207_v47, %s1211_s24 }
  0x5f   :  { %249 = vrot.lane.b32.xlu0 %v206_v48, %s1211_s24  ;;  %v1381_v48 = vstv %s1115_s26 }
  0x60   :  { %v508_v50 = vmul.f32 %v1381_v48, %v1241_v1  ;;  %v509_v51 = vmul.f32 %v1381_v48, %v1253_v8  ;;  %v514_v31 = vmul.f32 %v1381_v48, %v1263_v13  ;;  %v515_v33 = vmul.f32 %v1381_v48, %v1279_v21 }
  0x61   :  { %v513_v34 = vmul.f32 %v1381_v48, %v1265_v14 }
  0x62   :  { %v541_v56 = vrot.slane %v508_v50, 1  ;;  %v542_v57 = vrot.slane %v509_v51, 1  ;;  %v550_v38 = vrot.slane %v514_v31, 1 }
  0x64   :  { %v543_v4 = vsel %vm325_vm0, %v541_v56, %v542_v57 }
  0x66   :  { %440 = vrot.lane.b32.xlu2 %v418_v54, %s1210_s2  ;;  %257 = vrot.lane.b32.xlu1 %v210_v53, %s1211_s24  ;;  %v507_v53 = vmul.f32 %v1381_v48, %v1255_v9  ;;  %v506_v54 = vmul.f32 %v1381_v48, %v1243_v2 }
  0x67   :  { %255 = vrot.lane.b32.xlu0 %v209_v55, %s1211_s24 }
  0x68   :  { %v538_v61 = vrot.slane %v506_v54, 1 }
  0x6e   :  { %446 = vrot.lane.b32.xlu2 %v420_v58, %s1210_s2  ;;  %444 = vrot.lane.b32.xlu1 %v421_v60, %s1210_s2  ;;  %v539_v60 = vrot.slane %v507_v53, 1  ;;  %v516_v53 = vmul.f32 %v1381_v48, %v1277_v20 }
  0x6f   :  { %442 = vrot.lane.b32.xlu0 %v417_v52, %s1210_s2  ;;  %v1390_v52 = vstv %s61_s27 }
  0x70   :  { %v1349_v6 = vpop.permute.xlu2 %137  ;;  %v77_v55 = vmul.f32 %v1390_v52, %v1287_v25  ;;  %v64_v3 = vmul.f32 %v1390_v52, %v1255_v9  ;;  %v540_v11 = vsel %vm325_vm0, %v538_v61, %v539_v60  ;;  %v67_v29 = vmul.f32 %v1390_v52, %v1239_v0 }
  0x71   :  { %v70_v50 = vmul.f32 %v1390_v52, %v1265_v14 }
  0x76   :  { %452 = vrot.lane.b32.xlu2 %v427_v12, %s1210_s2  ;;  %450 = vrot.lane.b32.xlu1 %v423_v10, %s1210_s2  ;;  %v510_v10 = vmul.f32 %v1381_v48, %v1239_v0 }
  0x77   :  { %448 = vrot.lane.b32.xlu0 %v424_v18, %s1210_s2 }
  0x78   :  { %v1358_v24 = vpop.permute.xlu2 %139  ;;  %v544_v17 = vrot.slane %v510_v10, 1  ;;  %v73_v10 = vmul.f32 %v1390_v52, %v1277_v20 }
  0x7e   :  { %458 = vrot.lane.b32.xlu2 %v429_v22, %s1210_s2  ;;  %456 = vrot.lane.b32.xlu1 %v430_v28, %s1210_s2 }
  0x7f   :  { %454 = vrot.lane.b32.xlu0 %v426_v5, %s1210_s2  ;;  %v511_v5 = vmul.f32 %v1381_v48, %v1251_v7 }
  0x80   :  { %v1368_v36 = vpop.permute.xlu2 %145 }
  0x81   :  { %v545_v16 = vrot.slane %v511_v5, 1  ;;  %v63_v5 = vmul.f32 %v1390_v52, %v1243_v2 }
  0x83   :  { %v546_v30 = vsel %vm325_vm0, %v544_v17, %v545_v16  ;;  %v519_v17 = vmul.f32 %v1381_v48, %v1289_v26 }
  0x86   :  { %464 = vrot.lane.b32.xlu2 %v436_v39, %s1210_s2  ;;  %462 = vrot.lane.b32.xlu1 %v432_v37, %s1210_s2  ;;  %v181_v37 = vadd.f32 %v1349_v6, %v67_v29  ;;  %v551_v39 = vrot.slane %v515_v33, 1  ;;  %v517_v6 = vmul.f32 %v1381_v48, %v1275_v19 }
  0x87   :  { %460 = vrot.lane.b32.xlu0 %v433_v42, %s1210_s2  ;;  %v548_v42 = vrot.slane %v513_v34, 1 }
  0x88   :  { %v1377_v46 = vpop.permute.xlu2 %151  ;;  %v1379_v47 = vpop.permute.xlu1 %133  ;;  %v552_v51 = vsel %vm325_vm0, %v550_v38, %v551_v39 }
  0x89   :  { %v1383_v49 = vpop.permute.xlu0 %129 }
  0x8a   :  { %v177_v29 = vadd.f32 %v1383_v49, %v63_v5 }
  0x8e   :  { %470 = vrot.lane.b32.xlu2 %v438_v43, %s1210_s2  ;;  %468 = vrot.lane.b32.xlu1 %v439_v45, %s1210_s2 }
  0x8f   :  { %466 = vrot.lane.b32.xlu0 %v435_v35, %s1210_s2  ;;  %v512_v35 = vmul.f32 %v1381_v48, %v1267_v15 }
  0x90   :  { %v158_v58 = vpop.permute.xlu2 %157  ;;  %v1401_v59 = vpop.permute.xlu1 %135 }
  0x91   :  { %v1403_v62 = vadd.f32 %v158_v58, %v77_v55  ;;  %v132_v63 = vpop.permute.xlu0 %131  ;;  %v547_v43 = vrot.slane %v512_v35, 1  ;;  %v76_v55 = vmul.f32 %v1390_v52, %v1289_v26  ;;  %v553_v58 = vrot.slane %v516_v53, 1 }
  0x92   :  { %v178_v12 = vadd.f32 %v132_v63, %v64_v3  ;;  %v65_v53 = vmul.f32 %v1390_v52, %v1241_v1 }
  0x93   :  { %v549_v54 = vsel %vm325_vm0, %v547_v43, %v548_v42 }
  0x96   :  { %566 = vrot.lane.b32.xlu2 %v543_v4, %s1211_s24  ;;  %564 = vrot.lane.b32.xlu1 %v539_v60, %s1211_s24 }
  0x97   :  { %562 = vrot.lane.b32.xlu0 %v540_v11, %s1211_s24 }
  0x98   :  { %v144_v18 = vpop.permute.xlu1 %143  ;;  %v230_v22 = vpop.permute.xlu2 %229 }
  0x99   :  { %v1416_v23 = vadd.f32 %v230_v22, %v178_v12  ;;  %v1418_v28 = vpop.permute.xlu0 %141  ;;  %v184_v56 = vadd.f32 %v144_v18, %v70_v50  ;;  %v520_v12 = vmul.f32 %v1381_v48, %v1287_v25  ;;  %v518_v18 = vmul.f32 %v1381_v48, %v1291_v27 }
  0x9a   :  { %v78_v22 = vmul.f32 %v1390_v52, %v1299_v32  ;;  %v66_v50 = vmul.f32 %v1390_v52, %v1253_v8 }
  0x9b   :  { %v559_v31 = vrot.slane %v520_v12, 1  ;;  %v556_v38 = vrot.slane %v518_v18, 1 }
  0x9e   :  { %572 = vrot.lane.b32.xlu2 %v545_v16, %s1211_s24  ;;  %570 = vrot.lane.b32.xlu1 %v546_v30, %s1211_s24  ;;  %v521_v16 = vmul.f32 %v1381_v48, %v1299_v32 }
  0x9f   :  { %568 = vrot.lane.b32.xlu0 %v542_v57, %s1211_s24  ;;  %v554_v57 = vrot.slane %v517_v6, 1  ;;  %v1488_v6 = vstv %s1113_s29 }
  0xa0   :  { %v150_v40 = vpop.permute.xlu1 %149  ;;  %v236_v41 = vpop.permute.xlu2 %235  ;;  %v560_v33 = vrot.slane %v521_v16, 1 }
  0xa1   :  { %v1435_v44 = vadd.f32 %v236_v41, %v181_v37  ;;  %v1437_v45 = vpop.permute.xlu0 %147  ;;  %v555_v11 = vsel %vm325_vm0, %v553_v58, %v554_v57  ;;  %v187_v30 = vadd.f32 %v150_v40, %v73_v10  ;;  %v557_v37 = vrot.slane %v519_v17, 1 }
  0xa2   :  { %v1475_v41 = vstv %s1117_s28  ;;  %v561_v49 = vsel %vm325_vm0, %v559_v31, %v560_v33 }
  0xa3   :  { %v719_v40 = vmul.f32 %v1475_v41, %v1243_v2 }
  0xa6   :  { %578 = vrot.lane.b32.xlu2 %v552_v51, %s1211_s24  ;;  %576 = vrot.lane.b32.xlu1 %v548_v42, %s1211_s24 }
  0xa7   :  { %574 = vrot.lane.b32.xlu0 %v549_v54, %s1211_s24  ;;  %v558_v54 = vsel %vm325_vm0, %v556_v38, %v557_v37 }
  0xa8   :  { %v156_v60 = vpop.permute.xlu1 %155  ;;  %v242_v61 = vpop.permute.xlu2 %241 }
  0xa9   :  { %v190_v63 = vadd.f32 %v156_v60, %v76_v55  ;;  %v1452_v3 = vadd.f32 %v242_v61, %v184_v56  ;;  %v1454_v4 = vpop.permute.xlu0 %153  ;;  %v293_v55 = vmul.f32 %v1488_v6, %v1243_v2  ;;  %v1499_v56 = vmul.f32 %v1488_v6, %v1255_v9 }
  0xaa   :  { %v751_v60 = vrot.slane %v719_v40, 2  ;;  %v179_v61 = vadd.f32 %v1379_v47, %v65_v53  ;;  %v723_v47 = vmul.f32 %v1475_v41, %v1239_v0 }
  0xae   :  { %584 = vrot.lane.b32.xlu2 %v554_v57, %s1211_s24  ;;  %582 = vrot.lane.b32.xlu1 %v555_v11, %s1211_s24  ;;  %v180_v57 = vadd.f32 %v1401_v59, %v66_v50  ;;  %v326_v11 = vrot.slane %v293_v55, 1  ;;  %v69_v59 = vmul.f32 %v1390_v52, %v1267_v15  ;;  %v757_v50 = vrot.slane %v723_v47, 2 }
  0xaf   :  { %580 = vrot.lane.b32.xlu0 %v551_v39, %s1211_s24  ;;  %v720_v39 = vmul.f32 %v1475_v41, %v1255_v9 }
  0xb0   :  { %v248_v34 = vpop.permute.xlu2 %247  ;;  %v228_v35 = vpop.permute.xlu1 %227  ;;  %v183_v38 = vadd.f32 %v1418_v28, %v69_v59  ;;  %v1555_v59 = vmul.f32 %v1488_v6, %v1265_v14 }
  0xb1   :  { %v1477_v48 = vadd.f32 %v248_v34, %v187_v30  ;;  %v275_v42 = vadd.f32 %v228_v35, %v177_v29  ;;  %v160_v43 = vpop.permute.xlu0 %159  ;;  %v752_v58 = vrot.slane %v720_v39, 2  ;;  %v724_v30 = vmul.f32 %v1475_v41, %v1251_v7 }
  0xb2   :  { %v1481_v51 = vadd.f32 %v160_v43, %v78_v22  ;;  %v327_v22 = vrot.slane %v1499_v56, 1  ;;  %v722_v34 = vmul.f32 %v1475_v41, %v1253_v8  ;;  %v721_v35 = vmul.f32 %v1475_v41, %v1241_v1 }
  0xb3   :  { %v753_v29 = vsel %vm660_vm1, %v751_v60, %v752_v58 }
  0xb4   :  { %v328_v31 = vsel %vm325_vm0, %v326_v11, %v327_v22  ;;  %v754_v55 = vrot.slane %v721_v35, 2 }
  0xb5   :  { %v366_v43 = vadd.f32 %v328_v31, %v275_v42 }
  0xb6   :  { %590 = vrot.lane.b32.xlu2 %v561_v49, %s1211_s24  ;;  %588 = vrot.lane.b32.xlu1 %v557_v37, %s1211_s24  ;;  %v1529_v37 = vmul.f32 %v1488_v6, %v1253_v8  ;;  %v758_v49 = vrot.slane %v724_v30, 2 }
  0xb7   :  { %586 = vrot.lane.b32.xlu0 %v558_v54, %s1211_s24  ;;  %v755_v54 = vrot.slane %v722_v34, 2 }
  0xb8   :  { %v254_v5 = vpop.permute.xlu2 %253  ;;  %v234_v10 = vpop.permute.xlu1 %233  ;;  %v330_v42 = vrot.slane %v1529_v37, 1 }
  0xb9   :  { %v1504_v12 = vadd.f32 %v254_v5, %v190_v63  ;;  %v278_v16 = vadd.f32 %v234_v10, %v180_v57  ;;  %v232_v17 = vpop.permute.xlu0 %231  ;;  %v68_v63 = vmul.f32 %v1390_v52, %v1251_v7  ;;  %v725_v5 = vmul.f32 %v1475_v41, %v1267_v15 }
  0xba   :  { %v1506_v18 = vadd.f32 %v232_v17, %v179_v61  ;;  %v72_v61 = vmul.f32 %v1390_v52, %v1279_v21  ;;  %v71_v10 = vmul.f32 %v1390_v52, %v1263_v13  ;;  %v756_v11 = vsel %vm660_vm1, %v754_v55, %v755_v54 }
  0xbb   :  { %v182_v39 = vadd.f32 %v1358_v24, %v68_v63  ;;  %v726_v24 = vmul.f32 %v1475_v41, %v1265_v14  ;;  %v299_v17 = vmul.f32 %v1488_v6, %v1267_v15  ;;  %v369_v47 = vadd.f32 %v330_v42, %v278_v16 }
  0xbc   :  { %v760_v63 = vrot.slane %v725_v5, 2  ;;  %v185_v31 = vadd.f32 %v1368_v36, %v71_v10  ;;  %v75_v16 = vmul.f32 %v1390_v52, %v1291_v27 }
  0xbd   :  { %v761_v30 = vrot.slane %v726_v24, 2 }
  0xbe   :  { %777 = vrot.lane.b32.xlu2 %v752_v58, %s1210_s2  ;;  %775 = vrot.lane.b32.xlu1 %v753_v29, %s1210_s2  ;;  %v186_v29 = vadd.f32 %v1437_v45, %v72_v61  ;;  %v336_v45 = vrot.slane %v1555_v59, 1 }
  0xbf   :  { %592 = vrot.lane.b32.xlu0 %v560_v33, %s1211_s24  ;;  %v759_v33 = vsel %vm660_vm1, %v757_v50, %v758_v49 }
  0xc0   :  { %v441_v40 = vpop.permute.xlu2 %440  ;;  %v240_v53 = vpop.permute.xlu1 %239 }
  0xc1   :  { %v1534_v57 = vadd.f32 %v441_v40, %v366_v43  ;;  %v281_v58 = vadd.f32 %v240_v53, %v183_v38  ;;  %v238_v60 = vpop.permute.xlu0 %237  ;;  %v335_v38 = vrot.slane %v299_v17, 1  ;;  %v1562_v43 = vstv %s1118_s30 }
  0xc2   :  { %v1538_v28 = vadd.f32 %v238_v60, %v182_v39  ;;  %v843_v36 = vmul.f32 %v1562_v43, %v1241_v1  ;;  %v1576_v55 = vmul.f32 %v1562_v43, %v1253_v8  ;;  %v74_v60 = vmul.f32 %v1390_v52, %v1275_v19 }
  0xc3   :  { %v337_v61 = vsel %vm325_vm0, %v335_v38, %v336_v45  ;;  %v841_v24 = vmul.f32 %v1562_v43, %v1243_v2  ;;  %v1591_v8 = vmul.f32 %v1488_v6, %v1279_v21  ;;  %v189_v52 = vadd.f32 %v1454_v4, %v75_v16 }
  0xc4   :  { %v372_v5 = vadd.f32 %v337_v61, %v281_v58  ;;  %v876_v10 = vrot.slane %v843_v36, 2  ;;  %v307_v4 = vmul.f32 %v1488_v6, %v1287_v25  ;;  %v295_v58 = vmul.f32 %v1488_v6, %v1241_v1 }
  0xc5   :  { %v728_v38 = vmul.f32 %v1475_v41, %v1279_v21  ;;  %v1620_v1 = vmul.f32 %v1488_v6, %v1289_v26  ;;  %v845_v37 = vmul.f32 %v1562_v43, %v1239_v0  ;;  %v847_v56 = vmul.f32 %v1562_v43, %v1267_v15 }
  0xc6   :  { %783 = vrot.lane.b32.xlu2 %v759_v33, %s1210_s2  ;;  %781 = vrot.lane.b32.xlu1 %v755_v54, %s1210_s2  ;;  %v762_v54 = vsel %vm660_vm1, %v760_v63, %v761_v30  ;;  %v842_v33 = vmul.f32 %v1562_v43, %v1255_v9  ;;  %v188_v9 = vadd.f32 %v1377_v46, %v74_v60  ;;  %v329_v60 = vrot.slane %v295_v58, 1 }
  0xc7   :  { %779 = vrot.lane.b32.xlu0 %v756_v11, %s1210_s2  ;;  %v877_v11 = vrot.slane %v1576_v55, 2  ;;  %v347_v55 = vrot.slane %v307_v4, 1  ;;  %v729_v4 = vmul.f32 %v1475_v41, %v1277_v20  ;;  %v730_v58 = vmul.f32 %v1475_v41, %v1275_v19 }
  0xc8   :  { %v447_v34 = vpop.permute.xlu2 %446  ;;  %v246_v35 = vpop.permute.xlu1 %245 }
  0xc9   :  { %v1564_v50 = vadd.f32 %v447_v34, %v369_v47  ;;  %v284_v39 = vadd.f32 %v246_v35, %v186_v29  ;;  %v244_v40 = vpop.permute.xlu0 %243  ;;  %v874_v29 = vrot.slane %v842_v33, 2  ;;  %v873_v47 = vrot.slane %v841_v24, 2 }
  0xca   :  { %v1566_v53 = vadd.f32 %v244_v40, %v185_v31  ;;  %v308_v34 = vmul.f32 %v1488_v6, %v1299_v32  ;;  %v878_v46 = vsel %vm660_vm1, %v876_v10, %v877_v11  ;;  %v339_v35 = vrot.slane %v1591_v8, 1 }
  0xcb   :  { %v727_v40 = vmul.f32 %v1475_v41, %v1263_v13  ;;  %v875_v16 = vsel %vm660_vm1, %v873_v47, %v874_v29  ;;  %v764_v33 = vrot.slane %v728_v38, 2  ;;  %v298_v38 = vmul.f32 %v1488_v6, %v1251_v7 }
  0xcc   :  { %v348_v36 = vrot.slane %v308_v34, 1  ;;  %v375_v61 = vadd.f32 %v339_v35, %v284_v39  ;;  %v331_v39 = vsel %vm325_vm0, %v329_v60, %v330_v42 }
  0xcd   :  { %v763_v24 = vrot.slane %v727_v40, 2  ;;  %v297_v40 = vmul.f32 %v1488_v6, %v1239_v0 }
  0xce   :  { %789 = vrot.lane.b32.xlu2 %v761_v30, %s1210_s2  ;;  %787 = vrot.lane.b32.xlu1 %v762_v54, %s1210_s2  ;;  %v305_v54 = vmul.f32 %v1488_v6, %v1291_v27 }
  0xcf   :  { %785 = vrot.lane.b32.xlu0 %v758_v49, %s1210_s2  ;;  %v765_v34 = vsel %vm660_vm1, %v763_v24, %v764_v33 }
  0xd0   :  { %v453_v17 = vpop.permute.xlu2 %452  ;;  %v252_v2 = vpop.permute.xlu1 %251  ;;  %v344_v10 = vrot.slane %v305_v54, 1  ;;  %v368_v54 = vadd.f32 %v331_v39, %v1506_v18 }
  0xd1   :  { %v1597_v30 = vadd.f32 %v453_v17, %v372_v5  ;;  %v287_v63 = vadd.f32 %v252_v2, %v189_v52  ;;  %v250_v31 = vpop.permute.xlu0 %249 }
  0xd2   :  { %v1603_v49 = vadd.f32 %v250_v31, %v188_v9  ;;  %v345_v31 = vrot.slane %v1620_v1, 1 }
  0xd6   :  { %901 = vrot.lane.b32.xlu2 %v878_v46, %s1211_s24  ;;  %899 = vrot.lane.b32.xlu1 %v874_v29, %s1211_s24  ;;  %v349_v29 = vsel %vm325_vm0, %v347_v55, %v348_v36  ;;  %v346_v46 = vsel %vm325_vm0, %v344_v10, %v345_v31  ;;  %v767_v55 = vrot.slane %v730_v58, 2  ;;  %v333_v10 = vrot.slane %v298_v38, 1 }
  0xd7   :  { %897 = vrot.lane.b32.xlu0 %v875_v16, %s1211_s24  ;;  %v378_v16 = vadd.f32 %v346_v46, %v287_v63 }
  0xd8   :  { %v459_v52 = vpop.permute.xlu2 %458  ;;  %v258_v5 = vpop.permute.xlu1 %257 }
  0xd9   :  { %v1625_v9 = vadd.f32 %v459_v52, %v375_v61  ;;  %v290_v17 = vadd.f32 %v258_v5, %v1481_v51  ;;  %v256_v2 = vpop.permute.xlu0 %255  ;;  %v879_v52 = vrot.slane %v845_v37, 2 }
  0xda   :  { %v289_v47 = vadd.f32 %v256_v2, %v1403_v62  ;;  %v846_v62 = vmul.f32 %v1562_v43, %v1251_v7  ;;  %v367_v7 = vadd.f32 %v327_v22, %v1416_v23  ;;  %v301_v22 = vmul.f32 %v1488_v6, %v1263_v13 }
  0xdb   :  { %v381_v51 = vadd.f32 %v348_v36, %v290_v17  ;;  %v766_v36 = vrot.slane %v729_v4, 2  ;;  %v848_v17 = vmul.f32 %v1562_v43, %v1265_v14  ;;  %v882_v14 = vrot.slane %v847_v56, 2 }
  0xdc   :  { %v1646_v42 = vadd.f32 %v349_v29, %v289_v47  ;;  %v880_v24 = vrot.slane %v846_v62, 2  ;;  %v371_v29 = vadd.f32 %v333_v10, %v1538_v28  ;;  %v338_v4 = vrot.slane %v301_v22, 1 }
  0xdd   :  { %v768_v18 = vsel %vm660_vm1, %v766_v36, %v767_v55  ;;  %v883_v47 = vrot.slane %v848_v17, 2  ;;  %v850_v28 = vmul.f32 %v1562_v43, %v1279_v21  ;;  %v303_v36 = vmul.f32 %v1488_v6, %v1277_v20 }
  0xde   :  { %793 = vrot.lane.b32.xlu2 %v764_v33, %s1210_s2  ;;  %791 = vrot.lane.b32.xlu1 %v765_v34, %s1210_s2  ;;  %v881_v23 = vsel %vm660_vm1, %v879_v52, %v880_v24 }
  0xdf   :  { %903 = vrot.lane.b32.xlu0 %v877_v11, %s1211_s24  ;;  %v332_v11 = vrot.slane %v297_v40, 1  ;;  %v884_v38 = vsel %vm660_vm1, %v882_v14, %v883_v47  ;;  %v849_v40 = vmul.f32 %v1562_v43, %v1263_v13  ;;  %v886_v8 = vrot.slane %v850_v28, 2 }
  0xe0   :  { %v465_v60 = vpop.permute.xlu2 %464  ;;  %v445_v61 = vpop.permute.xlu1 %444 }
  0xe1   :  { %v1659_v0 = vadd.f32 %v465_v60, %v378_v16  ;;  %v1661_v33 = vadd.f32 %v445_v61, %v368_v54  ;;  %v443_v5 = vpop.permute.xlu0 %442  ;;  %v334_v2 = vsel %vm325_vm0, %v332_v11, %v333_v10  ;;  %v340_v16 = vsel %vm325_vm0, %v338_v4, %v339_v35 }
  0xe2   :  { %v1663_v63 = vadd.f32 %v443_v5, %v367_v7  ;;  %v370_v15 = vadd.f32 %v334_v2, %v1435_v44  ;;  %v732_v44 = vmul.f32 %v1475_v41, %v1289_v26  ;;  %v304_v54 = vmul.f32 %v1488_v6, %v1275_v19 }
  0xe3   :  { %v374_v13 = vadd.f32 %v340_v16, %v1566_v53  ;;  %v885_v21 = vrot.slane %v849_v40, 2  ;;  %v373_v61 = vadd.f32 %v336_v45, %v1452_v3  ;;  %v341_v10 = vrot.slane %v303_v36, 1 }
  0xe4   :  { %v770_v7 = vrot.slane %v732_v44, 2  ;;  %v342_v5 = vrot.slane %v304_v54, 1  ;;  %v734_v53 = vmul.f32 %v1475_v41, %v1299_v32  ;;  %v851_v4 = vmul.f32 %v1562_v43, %v1277_v20 }
  0xe5   :  { %v855_v54 = vmul.f32 %v1562_v43, %v1287_v25 }
  0xe6   :  { %795 = vrot.lane.b32.xlu2 %v768_v18, %s1210_s2  ;;  %907 = vrot.lane.b32.xlu1 %v880_v24, %s1211_s24  ;;  %v733_v18 = vmul.f32 %v1475_v41, %v1287_v25  ;;  %v343_v3 = vsel %vm325_vm0, %v341_v10, %v342_v5  ;;  %v377_v59 = vadd.f32 %v342_v5, %v1603_v49  ;;  %v773_v45 = vrot.slane %v734_v53, 2 }
  0xe7   :  { %905 = vrot.lane.b32.xlu0 %v881_v23, %s1211_s24  ;;  %v376_v2 = vadd.f32 %v343_v3, %v1477_v48  ;;  %v852_v49 = vmul.f32 %v1562_v43, %v1275_v19  ;;  %v888_v19 = vrot.slane %v851_v4, 2  ;;  %v894_v1 = vrot.slane %v855_v54, 2 }
  0xe8   :  { %v471_v39 = vpop.permute.xlu2 %470  ;;  %v451_v34 = vpop.permute.xlu1 %450  ;;  %v772_v56 = vrot.slane %v733_v18, 2 }
  0xe9   :  { %v1679_v58 = vadd.f32 %v471_v39, %v381_v51  ;;  %v493_v46 = vadd.f32 %v451_v34, %v371_v29  ;;  %v449_v62 = vpop.permute.xlu0 %448  ;;  %v731_v51 = vmul.f32 %v1475_v41, %v1291_v27  ;;  %v853_v34 = vmul.f32 %v1562_v43, %v1291_v27 }
  0xea   :  { %v1681_v37 = vadd.f32 %v449_v62, %v370_v15  ;;  %v774_v39 = vsel %vm660_vm1, %v772_v56, %v773_v45  ;;  %v854_v15 = vmul.f32 %v1562_v43, %v1289_v26  ;;  %v379_v26 = vadd.f32 %v345_v31, %v1504_v12 }
  0xeb   :  { %v769_v24 = vrot.slane %v731_v51, 2  ;;  %v891_v48 = vrot.slane %v853_v34, 2  ;;  %v856_v51 = vmul.f32 %v1562_v43, %v1299_v32  ;;  %v1751_v31 = vstv %s1116_s4 }
  0xec   :  { %v642_v43 = vmul.f32 %v1751_v31, %v1287_v25 }
  0xed   :  { %v771_v17 = vsel %vm660_vm1, %v769_v24, %v770_v7  ;;  %v895_v12 = vrot.slane %v856_v51, 2  ;;  %v1129_v51 = vld [vmem:[#allocation7] sm:$0xff] }
  0xee   :  { %911 = vrot.lane.b32.xlu2 %v883_v47, %s1211_s24  ;;  %909 = vrot.lane.b32.xlu1 %v884_v38, %s1211_s24  ;;  %v889_v38 = vrot.slane %v852_v49, 2  ;;  %v682_v24 = vrot.slane %v642_v43, 2  ;;  %v628_v54 = vmul.f32 %v1129_v51, %v1751_v31 }
  0xef   :  { %797 = vrot.lane.b32.xlu0 %v767_v55, %s1210_s2  ;;  %v887_v55 = vsel %vm660_vm1, %v885_v21, %v886_v8  ;;  %v643_v21 = vmul.f32 %v1751_v31, %v1299_v32 }
  0xf0   :  { %v1703_v35 = vpop.permute.xlu2 %566  ;;  %v457_v60 = vpop.permute.xlu1 %456  ;;  %v890_v36 = vsel %vm660_vm1, %v888_v19, %v889_v38 }
  0xf1   :  { %v496_v6 = vadd.f32 %v457_v60, %v374_v13  ;;  %v455_v52 = vpop.permute.xlu0 %454 }
  0xf2   :  { %v1708_v11 = vadd.f32 %v455_v52, %v373_v61  ;;  %v896_v61 = vsel %vm660_vm1, %v894_v1, %v895_v12  ;;  %v661_v1 = vrot.slane %v628_v54, 2 }
  0xf6   :  { %913 = vrot.lane.b32.xlu2 %v887_v55, %s1211_s24  ;;  %801 = vrot.lane.b32.xlu1 %v770_v7, %s1210_s2  ;;  %v683_v7 = vrot.slane %v643_v21, 2 }
  0xf7   :  { %799 = vrot.lane.b32.xlu0 %v771_v17, %s1210_s2 }
  0xf8   :  { %v573_v23 = vpop.permute.xlu2 %572  ;;  %v463_v22 = vpop.permute.xlu1 %462  ;;  %v684_v32 = vsel %vm660_vm1, %v682_v24, %v683_v7 }
  0xf9   :  { %v1722_v29 = vadd.f32 %v573_v23, %v493_v46  ;;  %v499_v41 = vadd.f32 %v463_v22, %v377_v59  ;;  %v461_v47 = vpop.permute.xlu0 %460  ;;  %v892_v46 = vrot.slane %v854_v15, 2  ;;  %v1127_v15 = vld [vmem:[#allocation7 + $0x10] sm:$0xff] }
  0xfa   :  { %v498_v14 = vadd.f32 %v461_v47, %v376_v2 }
  0xfb   :  { %v893_v44 = vsel %vm660_vm1, %v891_v48, %v892_v46 }
  0xfe   :  { %805 = vrot.lane.b32.xlu2 %v773_v45, %s1210_s2  ;;  %803 = vrot.lane.b32.xlu1 %v774_v39, %s1210_s2 }
  0xff   :  { %915 = vrot.lane.b32.xlu0 %v886_v8, %s1211_s24 }
 0x100   :  { %v579_v62 = vpop.permute.xlu2 %578  ;;  %v469_v27 = vpop.permute.xlu1 %468 }
 0x101   :  { %v1739_v40 = vadd.f32 %v579_v62, %v496_v6  ;;  %v502_v20 = vadd.f32 %v469_v27, %v1646_v42  ;;  %v467_v28 = vpop.permute.xlu0 %466  ;;  %v612_v62 = vadd.f32 %v1703_v35, %v1661_v33 }
 0x102   :  { %v501_v16 = vadd.f32 %v467_v28, %v379_v26 }
 0x106   :  { %921 = vrot.lane.b32.xlu2 %v893_v44, %s1211_s24  ;;  %919 = vrot.lane.b32.xlu1 %v889_v38, %s1211_s24 }
 0x107   :  { %917 = vrot.lane.b32.xlu0 %v890_v36, %s1211_s24 }
 0x108   :  { %v585_v42 = vpop.permute.xlu2 %584  ;;  %v1753_v13 = vpop.permute.xlu1 %564 }
 0x109   :  { %v1759_v8 = vadd.f32 %v585_v42, %v499_v41  ;;  %v563_v60 = vpop.permute.xlu0 %562  ;;  %v611_v43 = vadd.f32 %v1753_v13, %v1663_v63  ;;  %v1130_v63 = vld [vmem:[#allocation7 + $0x20] sm:$0xff] }
 0x10a   :  { %v632_v13 = vmul.f32 %v1130_v63, %v1751_v31 }
 0x10e   :  { %927 = vrot.lane.b32.xlu2 %v895_v12, %s1211_s24  ;;  %925 = vrot.lane.b32.xlu1 %v896_v61, %s1211_s24 }
 0x10f   :  { %923 = vrot.lane.b32.xlu0 %v892_v46, %s1211_s24 }
 0x110   :  { %v591_v6 = vpop.permute.xlu2 %590  ;;  %v571_v52 = vpop.permute.xlu1 %570 }
 0x111   :  { %v624_v5 = vadd.f32 %v591_v6, %v502_v20  ;;  %v1767_v25 = vadd.f32 %v571_v52, %v1681_v37  ;;  %v569_v10 = vpop.permute.xlu0 %568 }
 0x113   :  { %v1769_v55 = vadd.f32 %v684_v32, %v624_v5 }
 0x118   :  { %v778_v53 = vpop.permute.xlu2 %777  ;;  %v577_v18 = vpop.permute.xlu1 %576 }
 0x119   :  { %v1772_v17 = vadd.f32 %v577_v18, %v1708_v11  ;;  %v575_v3 = vpop.permute.xlu0 %574 }
 0x11a   :  { %v1775_v59 = vadd.f32 %v575_v3, %v1597_v30  ;;  %v1126_v30 = vld [vmem:[#allocation7 + $0x18] sm:$0xff] }
 0x11b   :  { %v631_v34 = vmul.f32 %v1126_v30, %v1751_v31 }
 0x11d   :  { %v665_v48 = vrot.slane %v631_v34, 2  ;;  %v1132_v34 = vld [vmem:[#allocation7 + $0x40] sm:$0xff] }
 0x120   :  { %v1777_v45 = vpop.permute.xlu2 %783  ;;  %v583_v56 = vpop.permute.xlu1 %582 }
 0x121   :  { %v1779_v23 = vadd.f32 %v583_v56, %v498_v14  ;;  %v581_v22 = vpop.permute.xlu0 %580  ;;  %v630_v14 = vmul.f32 %v1127_v15, %v1751_v31  ;;  %v636_v15 = vmul.f32 %v1132_v34, %v1751_v31 }
 0x122   :  { %v1782_v37 = vadd.f32 %v581_v22, %v1625_v9 }
 0x123   :  { %v664_v9 = vrot.slane %v630_v14, 2  ;;  %v1133_v14 = vld [vmem:[#allocation7 + $0x28] sm:$0xff] }
 0x128   :  { %v589_v2 = vpop.permute.xlu1 %588  ;;  %v1786_v39 = vpop.permute.xlu2 %789 }
 0x129   :  { %v1784_v41 = vadd.f32 %v589_v2, %v501_v16  ;;  %v587_v47 = vpop.permute.xlu0 %586  ;;  %v1128_v16 = vld [vmem:[#allocation7 + $0x8] sm:$0xff]  ;;  %v613_v2 = vadd.f32 %v569_v10, %v1564_v50 }
 0x12a   :  { %v1789_v11 = vadd.f32 %v587_v47, %v1659_v0  ;;  %v666_v0 = vsel %vm660_vm1, %v664_v9, %v665_v48  ;;  %v629_v44 = vmul.f32 %v1128_v16, %v1751_v31  ;;  %v667_v9 = vrot.slane %v632_v13, 2 }
 0x12b   :  { %v703_v19 = vadd.f32 %v666_v0, %v612_v62  ;;  %v704_v10 = vadd.f32 %v665_v48, %v613_v2 }
 0x12c   :  { %v662_v12 = vrot.slane %v629_v44, 2  ;;  %v1135_v44 = vld [vmem:[#allocation7 + $0x30] sm:$0xff] }
 0x12d   :  { %v634_v51 = vmul.f32 %v1135_v44, %v1751_v31 }
 0x12e   :  { %v663_v24 = vsel %vm660_vm1, %v661_v1, %v662_v12  ;;  %v702_v6 = vadd.f32 %v662_v12, %v611_v43 }
 0x12f   :  { %v670_v43 = vrot.slane %v634_v51, 2  ;;  %v1139_v51 = vld [vmem:[#allocation7 + $0x58] sm:$0xff] }
 0x130   :  { %v776_v49 = vpop.permute.xlu1 %775  ;;  %v902_v27 = vpop.permute.xlu2 %901  ;;  %v824_v32 = vadd.f32 %v778_v53, %v702_v6 }
 0x131   :  { %v593_v4 = vpop.permute.xlu0 %592 }
 0x132   :  { %v625_v46 = vadd.f32 %v593_v4, %v1679_v58  ;;  %v1804_v58 = vstv %s1901_s1  ;;  %s1212_s1 = smov [#allocation8]  }
 0x133   :  { %s1098_s7 = sshll.u32 %s1212_s1, 4  ;;  %s1099_s7 = int_to_ptr.vmem [resolvable:$true] %s1098_s7 }
 0x134   :  { %v1796_v26 = vadd.f32 %v683_v7, %v625_v46  ;;  %v610_v7 = vadd.f32 %v563_v60, %v1534_v57  ;;  %v1131_v60 = vld [vmem:[#allocation7 + $0x48] sm:$0xff] }
 0x135   :  { %v1822_v30 = vmul.f32 %v1131_v60, %v1751_v31 }
 0x136   :  { %v701_v52 = vadd.f32 %v663_v24, %v610_v7 }
 0x137   :  { %v674_v46 = vrot.slane %v1822_v30, 2 }
 0x138   :  { %v782_v38 = vpop.permute.xlu1 %781  ;;  %v1806_v35 = vpop.permute.xlu2 %793  ;;  %v823_v5 = vadd.f32 %v776_v49, %v701_v52  ;;  %v633_v49 = vmul.f32 %v1133_v14, %v1751_v31 }
 0x139   :  { %v780_v20 = vpop.permute.xlu0 %779  ;;  %v826_v62 = vadd.f32 %v782_v38, %v704_v10  ;;  %v1136_v10 = vld [vmem:[#allocation7 + $0x68] sm:$0xff] }
 0x13a   :  { %v825_v28 = vadd.f32 %v780_v20, %v703_v19  ;;  %v668_v19 = vrot.slane %v633_v49, 2 }
 0x13c   :  { %v947_v33 = vadd.f32 %v902_v27, %v825_v28  ;;  %v673_v27 = vrot.slane %v636_v15, 2  ;;  %v1134_v28 = vld [vmem:[#allocation7 + $0x38] sm:$0xff]  ;;  %v706_v12 = vadd.f32 %v668_v19, %v1722_v29 }
 0x13d   :  { %v635_v16 = vmul.f32 %v1134_v28, %v1751_v31 }
 0x13e   :  { %v965_v36 = vadd.f32 %v1804_v58, %v947_v33  ;;  %v669_v33 = vsel %vm660_vm1, %v667_v9, %v668_v19  ;;  %v1137_v9 = vld [vmem:[#allocation7 + $0x60] sm:$0xff] }
 0x13f   :  { %v705_v1 = vadd.f32 %v669_v33, %v1767_v25  ;;  %v710_v33 = vadd.f32 %v674_v46, %v1782_v37 }
 0x140   :  { %v1809_v42 = vpop.permute.xlu1 %787  ;;  %v987_v21 = vsel %vm979_vm2, %v965_v36, 0.0  ;;  %v1816_v18 = vpop.permute.xlu2 %795  ;;  %v675_v36 = vsel %vm660_vm1, %v673_v27, %v674_v46 }
 0x141   :  { %988 = vadd.xlane.f32.xlu2 %v987_v21  ;;  %v786_v61 = vpop.permute.xlu0 %785  ;;  %v671_v21 = vrot.slane %v635_v16, 2  ;;  %v709_v6 = vadd.f32 %v675_v36, %v1739_v40  ;;  %v827_v52 = vadd.f32 %v1777_v45, %v705_v1  ;;  %v1138_v16 = vld [vmem:[#allocation7 + $0x50] sm:$0xff] }
 0x142   :  { %v828_v24 = vadd.f32 %v786_v61, %v706_v12  ;;  %v638_v44 = vmul.f32 %v1138_v16, %v1751_v31 }
 0x143   :  { %v672_v29 = vsel %vm660_vm1, %v670_v43, %v671_v21 }
 0x144   :  { %v707_v40 = vadd.f32 %v672_v29, %v1775_v59  ;;  %v676_v36 = vrot.slane %v638_v44, 2 }
 0x148   :  { %v900_v3 = vpop.permute.xlu1 %899  ;;  %v912_v54 = vpop.permute.xlu2 %911 }
 0x149   :  { %v946_v56 = vadd.f32 %v900_v3, %v824_v32  ;;  %v898_v22 = vpop.permute.xlu0 %897 }
 0x14a   :  { %v945_v47 = vadd.f32 %v898_v22, %v823_v5  ;;  %v708_v22 = vadd.f32 %v671_v21, %v1772_v17  ;;  %v829_v17 = vadd.f32 %v1809_v42, %v707_v40  ;;  %v640_v42 = vmul.f32 %v1137_v9, %v1751_v31 }
 0x14b   :  { %v964_v57 = vadd.f32 %v1804_v58, %v946_v56 }
 0x14c   :  { %v963_v53 = vadd.f32 %v1804_v58, %v945_v47  ;;  %v830_v47 = vadd.f32 %v1786_v39, %v708_v22 }
 0x14d   :  { %v984_v50 = vsel %vm983_vm3, %v964_v57, 0.0 }
 0x14e   :  { %985 = vadd.xlane.f32.xlu1 %v984_v50  ;;  %v980_v4 = vsel %vm979_vm2, %v963_v53, 0.0  ;;  %v952_v57 = vadd.f32 %v912_v54, %v830_v47  ;;  %v639_v54 = vmul.f32 %v1139_v51, %v1751_v31 }
 0x14f   :  { %981 = vadd.xlane.f32.xlu0 %v980_v4  ;;  %v641_v4 = vmul.f32 %v1136_v10, %v1751_v31 }
 0x150   :  { %v792_v0 = vpop.permute.xlu1 %791  ;;  %v914_v63 = vpop.permute.xlu2 %913  ;;  %v970_v14 = vadd.f32 %v1804_v58, %v952_v57  ;;  %v677_v21 = vrot.slane %v639_v54, 2 }
 0x151   :  { %v904_v20 = vpop.permute.xlu0 %903  ;;  %v831_v5 = vadd.f32 %v792_v0, %v709_v6  ;;  %v680_v19 = vrot.slane %v641_v4, 2 }
 0x152   :  { %v948_v48 = vadd.f32 %v904_v20, %v826_v62  ;;  %v1002_v62 = vsel %vm983_vm3, %v970_v14, 0.0  ;;  %v679_v20 = vrot.slane %v640_v42, 2 }
 0x153   :  { %v953_v13 = vadd.f32 %v914_v63, %v831_v5 }
 0x154   :  { %v966_v38 = vadd.f32 %v1804_v58, %v948_v48  ;;  %v681_v48 = vsel %vm660_vm1, %v679_v20, %v680_v19 }
 0x155   :  { %v971_v39 = vadd.f32 %v1804_v58, %v953_v13  ;;  %v713_v12 = vadd.f32 %v681_v48, %v1789_v11 }
 0x156   :  { %v990_v7 = vsel %vm983_vm3, %v966_v38, 0.0  ;;  %v832_v38 = vadd.f32 %v1806_v35, %v710_v33 }
 0x157   :  { %991 = vadd.xlane.f32.xlu2 %v990_v7  ;;  %v1005_v59 = vsel %vm979_vm2, %v971_v39, 0.0 }
 0x158   :  { %v908_v32 = vpop.permute.xlu1 %907  ;;  %v806_v27 = vpop.permute.xlu2 %805 }
 0x159   :  { %v950_v3 = vadd.f32 %v908_v32, %v828_v24  ;;  %v906_v56 = vpop.permute.xlu0 %905  ;;  %v712_v32 = vadd.f32 %v677_v21, %v1759_v8  ;;  %v838_v8 = vadd.f32 %v806_v27, %v1796_v26 }
 0x15a   :  { %v949_v2 = vadd.f32 %v906_v56, %v827_v52  ;;  %v678_v52 = vsel %vm660_vm1, %v676_v36, %v677_v21 }
 0x15b   :  { %v968_v25 = vadd.f32 %v1804_v58, %v950_v3  ;;  %v711_v30 = vadd.f32 %v678_v52, %v1779_v23 }
 0x15c   :  { %v967_v61 = vadd.f32 %v1804_v58, %v949_v2 }
 0x15d   :  { %v996_v45 = vsel %vm983_vm3, %v968_v25, 0.0  ;;  %v833_v11 = vadd.f32 %v1816_v18, %v711_v30 }
 0x15e   :  { %997 = vadd.xlane.f32.xlu1 %v996_v45  ;;  %v993_v60 = vsel %vm979_vm2, %v967_v61, 0.0  ;;  %v714_v61 = vadd.f32 %v680_v19, %v1784_v41 }
 0x15f   :  { %994 = vadd.xlane.f32.xlu0 %v993_v60 }
 0x160   :  { %v910_v53 = vpop.permute.xlu1 %909  ;;  %v922_v43 = vpop.permute.xlu2 %921 }
 0x161   :  { %v951_v34 = vadd.f32 %v910_v53, %v829_v17  ;;  %v798_v15 = vpop.permute.xlu0 %797 }
 0x162   :  { %v834_v35 = vadd.f32 %v798_v15, %v712_v32 }
 0x163   :  { %v969_v49 = vadd.f32 %v1804_v58, %v951_v34 }
 0x165   :  { %v999_v50 = vsel %vm979_vm2, %v969_v49, 0.0 }
 0x166   :  { %1006 = vadd.xlane.f32.xlu1 %v1005_v59  ;;  %1000 = vadd.xlane.f32.xlu2 %v999_v50 }
 0x167   :  { %1003 = vadd.xlane.f32.xlu0 %v1002_v62  ;;  %v1045_v62 = vlaneseq }
 0x168   :  { %v802_v0 = vpop.permute.xlu1 %801  ;;  %v928_v2 = vpop.permute.xlu2 %927 }
 0x169   :  { %v800_v28 = vpop.permute.xlu0 %799  ;;  %v960_v63 = vadd.f32 %v928_v2, %v838_v8  ;;  %v836_v45 = vadd.f32 %v802_v0, %v714_v61  ;;  %v1046_v0 = vand.u32 127, %v1045_v62 }
 0x16a   :  { %v835_v24 = vadd.f32 %v800_v28, %v713_v12 }
 0x16b   :  { %v978_v53 = vadd.f32 %v1804_v58, %v960_v63  ;;  %v1048_v19 = vadd.s32 4294967288, %v1046_v0 }
 0x16c   :  { %v957_v37 = vadd.f32 %v922_v43, %v835_v24 }
 0x16d   :  { %v1026_v39 = vsel %vm983_vm3, %v978_v53, 0.0 }
 0x16e   :  { %v975_v29 = vadd.f32 %v1804_v58, %v957_v37 }
 0x170   :  { %v804_v1 = vpop.permute.xlu1 %803  ;;  %v1017_v18 = vsel %vm979_vm2, %v975_v29, 0.0 }
 0x171   :  { %v916_v7 = vpop.permute.xlu0 %915  ;;  %v837_v13 = vadd.f32 %v804_v1, %v1769_v55 }
 0x172   :  { %v954_v6 = vadd.f32 %v916_v7, %v832_v38 }
 0x174   :  { %v972_v31 = vadd.f32 %v1804_v58, %v954_v6 }
 0x176   :  { %v1008_v46 = vsel %vm983_vm3, %v972_v31, 0.0 }
 0x177   :  { %1009 = vadd.xlane.f32.xlu2 %v1008_v46 }
 0x178   :  { %v920_v5 = vpop.permute.xlu1 %919 }
 0x179   :  { %v956_v3 = vadd.f32 %v920_v5, %v834_v35  ;;  %v918_v56 = vpop.permute.xlu0 %917 }
 0x17a   :  { %v955_v22 = vadd.f32 %v918_v56, %v833_v11 }
 0x17b   :  { %v974_v25 = vadd.f32 %v1804_v58, %v956_v3 }
 0x17c   :  { %v973_v23 = vadd.f32 %v1804_v58, %v955_v22 }
 0x17d   :  { %v1014_v47 = vsel %vm983_vm3, %v974_v25, 0.0 }
 0x17e   :  { %1015 = vadd.xlane.f32.xlu1 %v1014_v47  ;;  %v1011_v40 = vsel %vm979_vm2, %v973_v23, 0.0 }
 0x17f   :  { %1018 = vadd.xlane.f32.xlu2 %v1017_v18  ;;  %1012 = vadd.xlane.f32.xlu0 %v1011_v40 }
 0x180   :  { %v926_v57 = vpop.permute.xlu1 %925 }
 0x181   :  { %v959_v60 = vadd.f32 %v926_v57, %v837_v13  ;;  %v924_v26 = vpop.permute.xlu0 %923 }
 0x182   :  { %v958_v17 = vadd.f32 %v924_v26, %v836_v45 }
 0x183   :  { %v977_v34 = vadd.f32 %v1804_v58, %v959_v60 }
 0x184   :  { %v976_v41 = vadd.f32 %v1804_v58, %v958_v17 }
 0x185   :  { %v1023_v15 = vsel %vm979_vm2, %v977_v34, 0.0 }
 0x186   :  { %1024 = vadd.xlane.f32.xlu1 %v1023_v15  ;;  %v1020_v55 = vsel %vm983_vm3, %v976_v41, 0.0 }
 0x187   :  { %1027 = vadd.xlane.f32.xlu2 %v1026_v39  ;;  %1021 = vadd.xlane.f32.xlu0 %v1020_v55 }
 0x1b4   :  { %v989_v14 = vpop.xlane.xlu2 %988 }
 0x1b5   :  { %v1052_v51 = vperm.slane %v989_v14, %v1046_v0 }
 0x1c1   :  { %v986_v49 = vpop.xlane.xlu1 %985 }
 0x1c2   :  { %v982_v59 = vpop.xlane.xlu0 %981  ;;  %v1049_v33 = vperm.slane %v986_v49, %v1048_v19 }
 0x1c3   :  { %v1047_v36 = vperm.slane %v982_v59, %v1046_v0 }
 0x1c5   :  { %v1051_v52 = vsel %vm1050_vm4, %v1049_v33, %v1047_v36 }
 0x1ca   :  { %v992_v50 = vpop.xlane.xlu2 %991 }
 0x1cb   :  { %v1053_v28 = vperm.slane %v992_v50, %v1048_v19 }
 0x1cd   :  { %v1054_v21 = vsel %vm1050_vm4, %v1053_v28, %v1052_v51 }
 0x1ce   :  { %v1074_v32 = vsel %vm1073_vm5, %v1054_v21, %v1051_v52 }
 0x1d1   :  { %v998_v10 = vpop.xlane.xlu1 %997 }
 0x1d2   :  { %v995_v4 = vpop.xlane.xlu0 %994  ;;  %v1056_v54 = vperm.slane %v998_v10, %v1048_v19 }
 0x1d3   :  { %v1055_v48 = vperm.slane %v995_v4, %v1046_v0 }
 0x1d5   :  { %v1057_v24 = vsel %vm1050_vm4, %v1056_v54, %v1055_v48 }
 0x1d6   :  { %v1076_v46 = vsel %vm1075_vm6, %v1057_v24, %v1074_v32 }
 0x1d9   :  { %v1001_v9 = vpop.xlane.xlu2 %1000  ;;  %v1007_v42 = vpop.xlane.xlu1 %1006 }
 0x1da   :  { %v1004_v27 = vpop.xlane.xlu0 %1003  ;;  %v1058_v38 = vperm.slane %v1001_v9, %v1046_v0  ;;  %v1061_v6 = vperm.slane %v1007_v42, %v1046_v0 }
 0x1db   :  { %v1059_v12 = vperm.slane %v1004_v27, %v1048_v19 }
 0x1dd   :  { %v1060_v31 = vsel %vm1050_vm4, %v1059_v12, %v1058_v38 }
 0x1de   :  { %v1078_v56 = vsel %vm1077_vm7, %v1060_v31, %v1076_v46 }
 0x1ea   :  { %v1010_v58 = vpop.xlane.xlu2 %1009 }
 0x1eb   :  { %v1062_v1 = vperm.slane %v1010_v58, %v1048_v19 }
 0x1ed   :  { %v1063_v30 = vsel %vm1050_vm4, %v1062_v1, %v1061_v6 }
 0x1ee   :  { %v1080_v25 = vsel %vm1079_vm8, %v1063_v30, %v1078_v56 }
 0x1f1   :  { %v1016_v20 = vpop.xlane.xlu1 %1015 }
 0x1f2   :  { %v1019_v16 = vpop.xlane.xlu2 %1018  ;;  %v1013_v44 = vpop.xlane.xlu0 %1012  ;;  %v1065_v43 = vperm.slane %v1016_v20, %v1048_v19 }
 0x1f3   :  { %v1064_v7 = vperm.slane %v1013_v44, %v1046_v0  ;;  %v1067_v22 = vperm.slane %v1019_v16, %v1046_v0 }
 0x1f5   :  { %v1066_v35 = vsel %vm1050_vm4, %v1065_v43, %v1064_v7 }
 0x1f6   :  { %v1082_v47 = vsel %vm1081_vm9, %v1066_v35, %v1080_v25 }
 0x1f9   :  { %v1025_v37 = vpop.xlane.xlu1 %1024 }
 0x1fa   :  { %v1070_v11 = vperm.slane %v1025_v37, %v1046_v0  ;;  %v1028_v5 = vpop.xlane.xlu2 %1027  ;;  %v1022_v3 = vpop.xlane.xlu0 %1021 }
 0x1fb   :  { %v1071_v29 = vperm.slane %v1028_v5, %v1048_v19  ;;  %v1068_v2 = vperm.slane %v1022_v3, %v1048_v19 }
 0x1fd   :  { %v1069_v8 = vsel %vm1050_vm4, %v1068_v2, %v1067_v22  ;;  %v1072_v23 = vsel %vm1050_vm4, %v1071_v29, %v1070_v11 }
 0x1fe   :  { %v1084_v63 = vsel %vm1083_vm10, %v1069_v8, %v1082_v47 }
 0x1ff   :  { %v1086_v61 = vsel %vm1085_vm11, %v1072_v23, %v1084_v63 }
 0x200   :  { %v1088_v18 = vsel %vm979_vm2, %v1086_v61, 0.0 }
 0x201   :  { %1089 = vadd.xlane.f32.xlu0 %v1088_v18 }
 0x274   :  { %v1090_v40 = vpop.xlane.xlu0 %1089 }
 0x275   :  { %v1091_v13 = vmul.f32 0.0051020407, %v1090_v40 }
 0x277   :  { %1092 = vst [vmem:[#allocation8] sm:$0xff] %v1091_v13 }
 0x278   :  { %1103 = dma.vmem_to_hbm [thread:$0]  %s1099_s7, 128, %s1101_s10, [#allocation5]  }
 0x279   :  { %1204 = dma.done.wait [#allocation5], 128  }
 0x27a   :  { %1205 = vsyncadd [#allocation5], 4294967168 }
 0x27b   :  { %1108 = vsyncpa [#allocation4], 1 }
 0x27c   :  { %1109 = vsyncpa [#allocation5], 1 }
 0x27d   :  { %1110 = vsyncpa [#allocation6], 1 }

</bundles_post_ra>
